<compile_context>
chip_gen: v7x
topology: tpu7x:2x2x1
jax: 0.10.0
libtpu: 0.0.40
codegen_flags: <defaults>
</compile_context>

<pallas_src>
import functools

import jax
import jax.numpy as jnp
from jax import lax
from jax.experimental import pallas as pl
from jax.experimental.pallas import tpu as pltpu


def _bart_attn_kernel(hs_ref, wqkv_ref, bqkv_ref, wo_ref, bo_ref,
                      out_ref, qkv_ref, ctx_ref, *, num_heads, head_dim):
    E = num_heads * head_dim
    hs = hs_ref[0].astype(jnp.bfloat16)                         # (T, E) bf16

    # ---- Fused QKV projection, staged to bf16 scratch in three (T,E) chunks
    # (q, k, v) so only one (T,E) f32 temporary is live at a time. ----
    for c in range(3):
        lo = c * E
        chunk = jnp.dot(hs, wqkv_ref[:, lo:lo + E],
                        preferred_element_type=jnp.float32)
        chunk = chunk + bqkv_ref[0:1, lo:lo + E]
        qkv_ref[:, lo:lo + E] = chunk.astype(jnp.bfloat16)

    # ---- Per-head-pair attention from the bf16 scratch.  Pairing keeps the
    # scratch loads and ctx stores 2*head_dim (=128 at BART scale) lanes wide
    # and dense; each head's (T,T) temporaries die within its iteration. ----
    group = 2 if num_heads % 2 == 0 else 1
    for g in range(num_heads // group):
        lo = g * group * head_dim
        w = group * head_dim
        q_slab = qkv_ref[:, lo:lo + w]                          # (T, g*d) bf16
        k_slab = qkv_ref[:, E + lo:E + lo + w]
        v_slab = qkv_ref[:, 2 * E + lo:2 * E + lo + w]

        ctx_parts = []
        for hh in range(group):
            a = hh * head_dim
            qh = q_slab[:, a:a + head_dim]                      # (T, d) bf16
            kh = k_slab[:, a:a + head_dim]
            vh = v_slab[:, a:a + head_dim]

            # scores = q @ k^T without an in-kernel transpose.
            s = lax.dot_general(qh, kh,
                                dimension_numbers=(((1,), (1,)), ((), ())),
                                preferred_element_type=jnp.float32)   # (T, T)

            # Numerically-stable softmax with deferred normalization.
            s = s - jnp.max(s, axis=-1, keepdims=True)
            e = jnp.exp(s)
            denom = jnp.sum(e, axis=-1, keepdims=True)                # (T, 1)
            ctx_h = jnp.dot(e.astype(jnp.bfloat16), vh,
                            preferred_element_type=jnp.float32)        # (T, d)
            ctx_h = ctx_h * pl.reciprocal(denom, approx=True)
            ctx_parts.append(ctx_h)

        ctx_ref[:, lo:lo + w] = jnp.concatenate(
            ctx_parts, axis=-1).astype(jnp.bfloat16)

    # ---- Fused output projection: one (T,E) x (E,E) matmul + bias. ----
    out = jnp.dot(ctx_ref[...], wo_ref[...],
                  preferred_element_type=jnp.float32) + bo_ref[0:1, :]
    out_ref[0] = out.astype(out_ref.dtype)


def bart_attention_pallas(hidden_states, params, num_heads):
    """hidden_states: (B, T, E) float32. Returns attn_output (B, T, E) f32."""
    B, T, E = hidden_states.shape
    H = num_heads
    assert E % H == 0, "embed_dim must be divisible by num_heads"
    d = E // H
    # NOTE: head_dim must stay a multiple of 8 (sublane) for real-shape
    # efficiency; BART uses d=64 (demo uses d=8).
    scaling = d ** (-0.5)

    wq, bq = params["q_proj"]
    wk, bk = params["k_proj"]
    wv, bv = params["v_proj"]
    wo, bo = params["out_proj"]

    # Fuse + pre-transpose weights in the wrapper (layout plumbing is free).
    # torch Linear is x @ W^T + b with W of shape (out, in).  The attention
    # scaling is folded into Wq AND bq (the reference applies it after bias):
    # (x Wq^T + bq) * s == x (s*Wq)^T + s*bq.
    wqkv_t = jnp.concatenate([wq * scaling, wk, wv], axis=0).T.astype(jnp.bfloat16)  # (E, 3E)
    bqkv = jnp.concatenate([bq * scaling, bk, bv]).reshape(1, 3 * E).astype(jnp.float32)
    wo_t = wo.T.astype(jnp.bfloat16)                                                  # (E, E)
    bo_2d = bo.reshape(1, E).astype(jnp.float32)

    kernel = functools.partial(_bart_attn_kernel, num_heads=H, head_dim=d)

    # VMEM budget: single-buffered resident weights, double-buffered f32 I/O
    # blocks, bf16 qkv/ctx scratches, plus the largest transient (one (T,E)
    # f32 projection chunk or one pair's (T,T) f32 score + exp temporaries).
    weights = (3 * E * E + E * E) * 2 + 4 * E * 4
    io = 2 * T * E * 4 + 2 * T * E * 4
    scratch = 3 * T * E * 2 + T * E * 2
    transient = max(T * E * 4, 2 * T * T * 4) + 4 * T * d * 4
    working = weights + io + scratch + transient
    try:
        phys_vmem = pltpu.get_tpu_info().vmem_capacity_bytes
    except Exception:
        phys_vmem = 64 * 1024 * 1024
    vmem_limit = int(min(max(int(1.3 * working), 4 * 1024 * 1024),
                         int(0.75 * phys_vmem)))

    # Advisory cost so XLA schedules surrounding ops around this long call.
    flops = int(B * (2 * T * E * 3 * E            # QKV projection
                     + H * 2 * 2 * T * T * d      # QK^T and PV per head
                     + 2 * T * E * E))            # out_proj
    transcendentals = int(B * H * T * T)          # exp
    bytes_accessed = int(B * T * E * 4 * 2        # hidden in + out (f32)
                         + (3 * E * E + E * E) * 2 + 4 * E * 4)

    # Resident (constant index_map) operands: no double-buffering needed.
    resident = pl.Buffered(1)

    out = pl.pallas_call(
        kernel,
        out_shape=jax.ShapeDtypeStruct((B, T, E), jnp.float32),
        grid_spec=pltpu.PrefetchScalarGridSpec(
            num_scalar_prefetch=0,
            grid=(B,),
            in_specs=[
                pl.BlockSpec((1, T, E), lambda b: (b, 0, 0)),        # hidden (f32)
                pl.BlockSpec((E, 3 * E), lambda b: (0, 0),
                             pipeline_mode=resident),                # fused Wqkv^T
                pl.BlockSpec((1, 3 * E), lambda b: (0, 0),
                             pipeline_mode=resident),                # fused bias
                pl.BlockSpec((E, E), lambda b: (0, 0),
                             pipeline_mode=resident),                # Wo^T
                pl.BlockSpec((1, E), lambda b: (0, 0),
                             pipeline_mode=resident),                # bo
            ],
            out_specs=pl.BlockSpec((1, T, E), lambda b: (b, 0, 0)),
            scratch_shapes=[
                pltpu.VMEM((T, 3 * E), jnp.bfloat16),                # staged qkv
                pltpu.VMEM((T, E), jnp.bfloat16),                    # ctx (all heads)
            ],
        ),
        compiler_params=pltpu.CompilerParams(
            dimension_semantics=("parallel",),
            vmem_limit_bytes=vmem_limit),
        cost_estimate=pl.CostEstimate(flops=flops,
                                      transcendentals=transcendentals,
                                      bytes_accessed=bytes_accessed),
    )(hidden_states, wqkv_t, bqkv, wo_t, bo_2d)
    return out


def bart_attention_ref(hidden_states, params, num_heads):
    """Plain-JAX (f32) reference mirroring the PyTorch forward (default args)."""
    B, T, E = hidden_states.shape
    H = num_heads
    d = E // H
    scaling = d ** (-0.5)

    wq, bq = params["q_proj"]
    wk, bk = params["k_proj"]
    wv, bv = params["v_proj"]
    wo, bo = params["out_proj"]

    q = (hidden_states @ wq.T + bq) * scaling
    k = hidden_states @ wk.T + bk
    v = hidden_states @ wv.T + bv

    def shape(x):  # (B,T,E) -> (B,H,T,d)
        return x.reshape(B, T, H, d).transpose(0, 2, 1, 3)

    q, k, v = shape(q), shape(k), shape(v)
    scores = jnp.einsum("bhtd,bhsd->bhts", q, k)
    probs = jax.nn.softmax(scores, axis=-1)
    ctx = jnp.einsum("bhts,bhsd->bhtd", probs, v)
    ctx = ctx.transpose(0, 2, 1, 3).reshape(B, T, E)
    return ctx @ wo.T + bo


def init_params(key, embed_dim):
    E = embed_dim
    keys = jax.random.split(key, 8)

    def lin(kw, kb):
        w = 0.02 * jax.random.normal(kw, (E, E), dtype=jnp.float32)
        b = 0.02 * jax.random.normal(kb, (E,), dtype=jnp.float32)
        return (w, b)

    return {
        "q_proj": lin(keys[0], keys[1]),
        "k_proj": lin(keys[2], keys[3]),
        "v_proj": lin(keys[4], keys[5]),
        "out_proj": lin(keys[6], keys[7]),
    }


if __name__ == "__main__":
    # Small shapes: batch=2, seq=8, embed_dim=32, num_heads=4 (head_dim=8)
    B, T, E, H = 2, 8, 32, 4

    key = jax.random.PRNGKey(0)
    k_params, k_x = jax.random.split(key)
    params = init_params(k_params, E)
    hidden_states = jax.random.normal(k_x, (B, T, E), dtype=jnp.float32)

    out = bart_attention_pallas(hidden_states, params, num_heads=H)
    out = jax.block_until_ready(out)

    ref = bart_attention_ref(hidden_states, params, num_heads=H)
    assert out.shape == (B, T, E)
    # bf16 matmul operands with f32 accumulation -> bf16-appropriate tolerance.
    max_err = jnp.max(jnp.abs(out - ref))
    assert jnp.allclose(out, ref, atol=1e-3, rtol=1e-3), (
        f"max abs err = {max_err}")

    print("KERNEL_OK")
</pallas_src>

<mosaic_0001>
module attributes {stable_mosaic.version = 11 : i64} {
  func.func @_bart_attn_kernel(%arg0: i32, %arg1: memref<1x8x32xf32, #tpu.memory_space<vmem>>, %arg2: memref<32x96xbf16, #tpu.memory_space<vmem>>, %arg3: memref<1x96xf32, #tpu.memory_space<vmem>>, %arg4: memref<32x32xbf16, #tpu.memory_space<vmem>>, %arg5: memref<1x32xf32, #tpu.memory_space<vmem>>, %arg6: memref<1x8x32xf32, #tpu.memory_space<vmem>>, %arg7: memref<8x96xbf16, #tpu.memory_space<vmem>>, %arg8: memref<8x32xbf16, #tpu.memory_space<vmem>>) attributes {dimension_semantics = [#tpu.dimension_semantics<parallel>], iteration_bounds = array<i64: 2>, scalar_prefetch = 0 : i64, scratch_operands = 2 : i64, tpu.core_type = #tpu.core_type<tc>, window_params = [{transform_indices = @transform_0, window_bounds = array<i64: 1, 8, 32>}, {pipeline_mode = #tpu.pipeline_mode<synchronous>, transform_indices = @transform_1, window_bounds = array<i64: 32, 96>}, {pipeline_mode = #tpu.pipeline_mode<synchronous>, transform_indices = @transform_2, window_bounds = array<i64: 1, 96>}, {pipeline_mode = #tpu.pipeline_mode<synchronous>, transform_indices = @transform_3, window_bounds = array<i64: 32, 32>}, {pipeline_mode = #tpu.pipeline_mode<synchronous>, transform_indices = @transform_4, window_bounds = array<i64: 1, 32>}, {transform_indices = @transform_5, window_bounds = array<i64: 1, 8, 32>}]} {
    %c0 = arith.constant 0 : index
    %c0_0 = arith.constant 0 : index
    %c0_1 = arith.constant 0 : index
    %0 = vector.load %arg1[%c0, %c0_0, %c0_1] : memref<1x8x32xf32, #tpu.memory_space<vmem>>, vector<1x8x32xf32>
    %1 = vector.shape_cast %0 : vector<1x8x32xf32> to vector<8x32xf32>
    %2 = arith.truncf %1 : vector<8x32xf32> to vector<8x32xbf16>
    %c0_2 = arith.constant 0 : index
    %c0_3 = arith.constant 0 : index
    %3 = vector.load %arg2[%c0_2, %c0_3] : memref<32x96xbf16, #tpu.memory_space<vmem>>, vector<32x32xbf16>
    %cst = arith.constant dense<0.000000e+00> : vector<8x32xf32>
    %4 = tpu.matmul %2, %3, %cst {dimension_numbers = #tpu.dot_dimension_numbers<[1], [0], [0], [1], [0, 0, 1, 1], [], []>} : vector<8x32xbf16>, vector<32x32xbf16>, vector<8x32xf32> -> vector<8x32xf32>
    %c0_4 = arith.constant 0 : index
    %c0_5 = arith.constant 0 : index
    %5 = vector.load %arg3[%c0_4, %c0_5] : memref<1x96xf32, #tpu.memory_space<vmem>>, vector<1x32xf32>
    %6 = vector.broadcast %5 : vector<1x32xf32> to vector<8x32xf32>
    %7 = arith.addf %4, %6 : vector<8x32xf32>
    %8 = arith.truncf %7 : vector<8x32xf32> to vector<8x32xbf16>
    %c0_6 = arith.constant 0 : index
    %c0_7 = arith.constant 0 : index
    %9 = vector.load %arg7[%c0_6, %c0_7] : memref<8x96xbf16, #tpu.memory_space<vmem>>, vector<8x32xbf16>
    tpu.vector_store %arg7[%c0_6, %c0_7], %8 {strides = array<i32>} : memref<8x96xbf16, #tpu.memory_space<vmem>>, vector<8x32xbf16>,
    %c0_8 = arith.constant 0 : index
    %c32 = arith.constant 32 : index
    %10 = vector.load %arg2[%c0_8, %c32] : memref<32x96xbf16, #tpu.memory_space<vmem>>, vector<32x32xbf16>
    %cst_9 = arith.constant dense<0.000000e+00> : vector<8x32xf32>
    %11 = tpu.matmul %2, %10, %cst_9 {dimension_numbers = #tpu.dot_dimension_numbers<[1], [0], [0], [1], [0, 0, 1, 1], [], []>} : vector<8x32xbf16>, vector<32x32xbf16>, vector<8x32xf32> -> vector<8x32xf32>
    %c0_10 = arith.constant 0 : index
    %c32_11 = arith.constant 32 : index
    %12 = vector.load %arg3[%c0_10, %c32_11] : memref<1x96xf32, #tpu.memory_space<vmem>>, vector<1x32xf32>
    %13 = vector.broadcast %12 : vector<1x32xf32> to vector<8x32xf32>
    %14 = arith.addf %11, %13 : vector<8x32xf32>
    %15 = arith.truncf %14 : vector<8x32xf32> to vector<8x32xbf16>
    %c0_12 = arith.constant 0 : index
    %c32_13 = arith.constant 32 : index
    %16 = vector.load %arg7[%c0_12, %c32_13] : memref<8x96xbf16, #tpu.memory_space<vmem>>, vector<8x32xbf16>
    tpu.vector_store %arg7[%c0_12, %c32_13], %15 {strides = array<i32>} : memref<8x96xbf16, #tpu.memory_space<vmem>>, vector<8x32xbf16>,
    %c0_14 = arith.constant 0 : index
    %c64 = arith.constant 64 : index
    %17 = vector.load %arg2[%c0_14, %c64] : memref<32x96xbf16, #tpu.memory_space<vmem>>, vector<32x32xbf16>
    %cst_15 = arith.constant dense<0.000000e+00> : vector<8x32xf32>
    %18 = tpu.matmul %2, %17, %cst_15 {dimension_numbers = #tpu.dot_dimension_numbers<[1], [0], [0], [1], [0, 0, 1, 1], [], []>} : vector<8x32xbf16>, vector<32x32xbf16>, vector<8x32xf32> -> vector<8x32xf32>
    %c0_16 = arith.constant 0 : index
    %c64_17 = arith.constant 64 : index
    %19 = vector.load %arg3[%c0_16, %c64_17] : memref<1x96xf32, #tpu.memory_space<vmem>>, vector<1x32xf32>
    %20 = vector.broadcast %19 : vector<1x32xf32> to vector<8x32xf32>
    %21 = arith.addf %18, %20 : vector<8x32xf32>
    %22 = arith.truncf %21 : vector<8x32xf32> to vector<8x32xbf16>
    %c0_18 = arith.constant 0 : index
    %c64_19 = arith.constant 64 : index
    %23 = vector.load %arg7[%c0_18, %c64_19] : memref<8x96xbf16, #tpu.memory_space<vmem>>, vector<8x32xbf16>
    tpu.vector_store %arg7[%c0_18, %c64_19], %22 {strides = array<i32>} : memref<8x96xbf16, #tpu.memory_space<vmem>>, vector<8x32xbf16>,
    %c0_20 = arith.constant 0 : index
    %c0_21 = arith.constant 0 : index
    %24 = vector.load %arg7[%c0_20, %c0_21] : memref<8x96xbf16, #tpu.memory_space<vmem>>, vector<8x16xbf16>
    %c0_22 = arith.constant 0 : index
    %c32_23 = arith.constant 32 : index
    %25 = vector.load %arg7[%c0_22, %c32_23] : memref<8x96xbf16, #tpu.memory_space<vmem>>, vector<8x16xbf16>
    %c0_24 = arith.constant 0 : index
    %c64_25 = arith.constant 64 : index
    %26 = vector.load %arg7[%c0_24, %c64_25] : memref<8x96xbf16, #tpu.memory_space<vmem>>, vector<8x16xbf16>
    %27 = vector.extract_strided_slice %24 {offsets = [0, 0], sizes = [8, 8], strides = [1, 1]} : vector<8x16xbf16> to vector<8x8xbf16>
    %28 = vector.extract_strided_slice %25 {offsets = [0, 0], sizes = [8, 8], strides = [1, 1]} : vector<8x16xbf16> to vector<8x8xbf16>
    %29 = vector.extract_strided_slice %26 {offsets = [0, 0], sizes = [8, 8], strides = [1, 1]} : vector<8x16xbf16> to vector<8x8xbf16>
    %cst_26 = arith.constant dense<0.000000e+00> : vector<8x8xf32>
    %30 = tpu.matmul %27, %28, %cst_26 {dimension_numbers = #tpu.dot_dimension_numbers<[1], [1], [0], [0], [0, 0, 1, 0], [], []>} : vector<8x8xbf16>, vector<8x8xbf16>, vector<8x8xf32> -> vector<8x8xf32>
    %cst_27 = arith.constant dense<0xFF800000> : vector<8xf32>
    %31 = vector.multi_reduction <maximumf>, %30, %cst_27 [1] : vector<8x8xf32> to vector<8xf32>
    %32 = vector.shape_cast %31 : vector<8xf32> to vector<8x1xf32>
    %33 = vector.broadcast %32 : vector<8x1xf32> to vector<8x8xf32>
    %34 = arith.subf %30, %33 : vector<8x8xf32>
    %35 = math.exp %34 : vector<8x8xf32>
    %cst_28 = arith.constant dense<0.000000e+00> : vector<8xf32>
    %36 = vector.multi_reduction <add>, %35, %cst_28 [1] : vector<8x8xf32> to vector<8xf32>
    %37 = vector.shape_cast %36 : vector<8xf32> to vector<8x1xf32>
    %38 = arith.truncf %35 : vector<8x8xf32> to vector<8x8xbf16>
    %cst_29 = arith.constant dense<0.000000e+00> : vector<8x8xf32>
    %39 = tpu.matmul %38, %29, %cst_29 {dimension_numbers = #tpu.dot_dimension_numbers<[1], [0], [0], [1], [0, 0, 1, 1], [], []>} : vector<8x8xbf16>, vector<8x8xbf16>, vector<8x8xf32> -> vector<8x8xf32>
    %40 = tpu.reciprocal %37 {approx = true} : vector<8x1xf32> -> vector<8x1xf32>
    %41 = vector.broadcast %40 : vector<8x1xf32> to vector<8x8xf32>
    %42 = arith.mulf %39, %41 : vector<8x8xf32>
    %43 = vector.extract_strided_slice %24 {offsets = [0, 8], sizes = [8, 8], strides = [1, 1]} : vector<8x16xbf16> to vector<8x8xbf16>
    %44 = vector.extract_strided_slice %25 {offsets = [0, 8], sizes = [8, 8], strides = [1, 1]} : vector<8x16xbf16> to vector<8x8xbf16>
    %45 = vector.extract_strided_slice %26 {offsets = [0, 8], sizes = [8, 8], strides = [1, 1]} : vector<8x16xbf16> to vector<8x8xbf16>
    %cst_30 = arith.constant dense<0.000000e+00> : vector<8x8xf32>
    %46 = tpu.matmul %43, %44, %cst_30 {dimension_numbers = #tpu.dot_dimension_numbers<[1], [1], [0], [0], [0, 0, 1, 0], [], []>} : vector<8x8xbf16>, vector<8x8xbf16>, vector<8x8xf32> -> vector<8x8xf32>
    %cst_31 = arith.constant dense<0xFF800000> : vector<8xf32>
    %47 = vector.multi_reduction <maximumf>, %46, %cst_31 [1] : vector<8x8xf32> to vector<8xf32>
    %48 = vector.shape_cast %47 : vector<8xf32> to vector<8x1xf32>
    %49 = vector.broadcast %48 : vector<8x1xf32> to vector<8x8xf32>
    %50 = arith.subf %46, %49 : vector<8x8xf32>
    %51 = math.exp %50 : vector<8x8xf32>
    %cst_32 = arith.constant dense<0.000000e+00> : vector<8xf32>
    %52 = vector.multi_reduction <add>, %51, %cst_32 [1] : vector<8x8xf32> to vector<8xf32>
    %53 = vector.shape_cast %52 : vector<8xf32> to vector<8x1xf32>
    %54 = arith.truncf %51 : vector<8x8xf32> to vector<8x8xbf16>
    %cst_33 = arith.constant dense<0.000000e+00> : vector<8x8xf32>
    %55 = tpu.matmul %54, %45, %cst_33 {dimension_numbers = #tpu.dot_dimension_numbers<[1], [0], [0], [1], [0, 0, 1, 1], [], []>} : vector<8x8xbf16>, vector<8x8xbf16>, vector<8x8xf32> -> vector<8x8xf32>
    %56 = tpu.reciprocal %53 {approx = true} : vector<8x1xf32> -> vector<8x1xf32>
    %57 = vector.broadcast %56 : vector<8x1xf32> to vector<8x8xf32>
    %58 = arith.mulf %55, %57 : vector<8x8xf32>
    %59 = tpu.concatenate %42, %58 in 1 : vector<8x8xf32>, vector<8x8xf32> -> vector<8x16xf32>
    %60 = arith.truncf %59 : vector<8x16xf32> to vector<8x16xbf16>
    %c0_34 = arith.constant 0 : index
    %c0_35 = arith.constant 0 : index
    %61 = vector.load %arg8[%c0_34, %c0_35] : memref<8x32xbf16, #tpu.memory_space<vmem>>, vector<8x16xbf16>
    tpu.vector_store %arg8[%c0_34, %c0_35], %60 {strides = array<i32>} : memref<8x32xbf16, #tpu.memory_space<vmem>>, vector<8x16xbf16>,
    %c0_36 = arith.constant 0 : index
    %c16 = arith.constant 16 : index
    %62 = vector.load %arg7[%c0_36, %c16] : memref<8x96xbf16, #tpu.memory_space<vmem>>, vector<8x16xbf16>
    %c0_37 = arith.constant 0 : index
    %c48 = arith.constant 48 : index
    %63 = vector.load %arg7[%c0_37, %c48] : memref<8x96xbf16, #tpu.memory_space<vmem>>, vector<8x16xbf16>
    %c0_38 = arith.constant 0 : index
    %c80 = arith.constant 80 : index
    %64 = vector.load %arg7[%c0_38, %c80] : memref<8x96xbf16, #tpu.memory_space<vmem>>, vector<8x16xbf16>
    %65 = vector.extract_strided_slice %62 {offsets = [0, 0], sizes = [8, 8], strides = [1, 1]} : vector<8x16xbf16> to vector<8x8xbf16>
    %66 = vector.extract_strided_slice %63 {offsets = [0, 0], sizes = [8, 8], strides = [1, 1]} : vector<8x16xbf16> to vector<8x8xbf16>
    %67 = vector.extract_strided_slice %64 {offsets = [0, 0], sizes = [8, 8], strides = [1, 1]} : vector<8x16xbf16> to vector<8x8xbf16>
    %cst_39 = arith.constant dense<0.000000e+00> : vector<8x8xf32>
    %68 = tpu.matmul %65, %66, %cst_39 {dimension_numbers = #tpu.dot_dimension_numbers<[1], [1], [0], [0], [0, 0, 1, 0], [], []>} : vector<8x8xbf16>, vector<8x8xbf16>, vector<8x8xf32> -> vector<8x8xf32>
    %cst_40 = arith.constant dense<0xFF800000> : vector<8xf32>
    %69 = vector.multi_reduction <maximumf>, %68, %cst_40 [1] : vector<8x8xf32> to vector<8xf32>
    %70 = vector.shape_cast %69 : vector<8xf32> to vector<8x1xf32>
    %71 = vector.broadcast %70 : vector<8x1xf32> to vector<8x8xf32>
    %72 = arith.subf %68, %71 : vector<8x8xf32>
    %73 = math.exp %72 : vector<8x8xf32>
    %cst_41 = arith.constant dense<0.000000e+00> : vector<8xf32>
    %74 = vector.multi_reduction <add>, %73, %cst_41 [1] : vector<8x8xf32> to vector<8xf32>
    %75 = vector.shape_cast %74 : vector<8xf32> to vector<8x1xf32>
    %76 = arith.truncf %73 : vector<8x8xf32> to vector<8x8xbf16>
    %cst_42 = arith.constant dense<0.000000e+00> : vector<8x8xf32>
    %77 = tpu.matmul %76, %67, %cst_42 {dimension_numbers = #tpu.dot_dimension_numbers<[1], [0], [0], [1], [0, 0, 1, 1], [], []>} : vector<8x8xbf16>, vector<8x8xbf16>, vector<8x8xf32> -> vector<8x8xf32>
    %78 = tpu.reciprocal %75 {approx = true} : vector<8x1xf32> -> vector<8x1xf32>
    %79 = vector.broadcast %78 : vector<8x1xf32> to vector<8x8xf32>
    %80 = arith.mulf %77, %79 : vector<8x8xf32>
    %81 = vector.extract_strided_slice %62 {offsets = [0, 8], sizes = [8, 8], strides = [1, 1]} : vector<8x16xbf16> to vector<8x8xbf16>
    %82 = vector.extract_strided_slice %63 {offsets = [0, 8], sizes = [8, 8], strides = [1, 1]} : vector<8x16xbf16> to vector<8x8xbf16>
    %83 = vector.extract_strided_slice %64 {offsets = [0, 8], sizes = [8, 8], strides = [1, 1]} : vector<8x16xbf16> to vector<8x8xbf16>
    %cst_43 = arith.constant dense<0.000000e+00> : vector<8x8xf32>
    %84 = tpu.matmul %81, %82, %cst_43 {dimension_numbers = #tpu.dot_dimension_numbers<[1], [1], [0], [0], [0, 0, 1, 0], [], []>} : vector<8x8xbf16>, vector<8x8xbf16>, vector<8x8xf32> -> vector<8x8xf32>
    %cst_44 = arith.constant dense<0xFF800000> : vector<8xf32>
    %85 = vector.multi_reduction <maximumf>, %84, %cst_44 [1] : vector<8x8xf32> to vector<8xf32>
    %86 = vector.shape_cast %85 : vector<8xf32> to vector<8x1xf32>
    %87 = vector.broadcast %86 : vector<8x1xf32> to vector<8x8xf32>
    %88 = arith.subf %84, %87 : vector<8x8xf32>
    %89 = math.exp %88 : vector<8x8xf32>
    %cst_45 = arith.constant dense<0.000000e+00> : vector<8xf32>
    %90 = vector.multi_reduction <add>, %89, %cst_45 [1] : vector<8x8xf32> to vector<8xf32>
    %91 = vector.shape_cast %90 : vector<8xf32> to vector<8x1xf32>
    %92 = arith.truncf %89 : vector<8x8xf32> to vector<8x8xbf16>
    %cst_46 = arith.constant dense<0.000000e+00> : vector<8x8xf32>
    %93 = tpu.matmul %92, %83, %cst_46 {dimension_numbers = #tpu.dot_dimension_numbers<[1], [0], [0], [1], [0, 0, 1, 1], [], []>} : vector<8x8xbf16>, vector<8x8xbf16>, vector<8x8xf32> -> vector<8x8xf32>
    %94 = tpu.reciprocal %91 {approx = true} : vector<8x1xf32> -> vector<8x1xf32>
    %95 = vector.broadcast %94 : vector<8x1xf32> to vector<8x8xf32>
    %96 = arith.mulf %93, %95 : vector<8x8xf32>
    %97 = tpu.concatenate %80, %96 in 1 : vector<8x8xf32>, vector<8x8xf32> -> vector<8x16xf32>
    %98 = arith.truncf %97 : vector<8x16xf32> to vector<8x16xbf16>
    %c0_47 = arith.constant 0 : index
    %c16_48 = arith.constant 16 : index
    %99 = vector.load %arg8[%c0_47, %c16_48] : memref<8x32xbf16, #tpu.memory_space<vmem>>, vector<8x16xbf16>
    tpu.vector_store %arg8[%c0_47, %c16_48], %98 {strides = array<i32>} : memref<8x32xbf16, #tpu.memory_space<vmem>>, vector<8x16xbf16>,
    %c0_49 = arith.constant 0 : index
    %c0_50 = arith.constant 0 : index
    %100 = vector.load %arg8[%c0_49, %c0_50] : memref<8x32xbf16, #tpu.memory_space<vmem>>, vector<8x32xbf16>
    %c0_51 = arith.constant 0 : index
    %c0_52 = arith.constant 0 : index
    %101 = vector.load %arg4[%c0_51, %c0_52] : memref<32x32xbf16, #tpu.memory_space<vmem>>, vector<32x32xbf16>
    %cst_53 = arith.constant dense<0.000000e+00> : vector<8x32xf32>
    %102 = tpu.matmul %100, %101, %cst_53 {dimension_numbers = #tpu.dot_dimension_numbers<[1], [0], [0], [1], [0, 0, 1, 1], [], []>} : vector<8x32xbf16>, vector<32x32xbf16>, vector<8x32xf32> -> vector<8x32xf32>
    %c0_54 = arith.constant 0 : index
    %c0_55 = arith.constant 0 : index
    %103 = vector.load %arg5[%c0_54, %c0_55] : memref<1x32xf32, #tpu.memory_space<vmem>>, vector<1x32xf32>
    %104 = vector.broadcast %103 : vector<1x32xf32> to vector<8x32xf32>
    %105 = arith.addf %102, %104 : vector<8x32xf32>
    %c0_56 = arith.constant 0 : index
    %c0_57 = arith.constant 0 : index
    %c0_58 = arith.constant 0 : index
    %106 = vector.load %arg6[%c0_56, %c0_57, %c0_58] : memref<1x8x32xf32, #tpu.memory_space<vmem>>, vector<1x8x32xf32>
    %107 = vector.shape_cast %106 : vector<1x8x32xf32> to vector<8x32xf32>
    %108 = vector.shape_cast %105 : vector<8x32xf32> to vector<1x8x32xf32>
    tpu.vector_store %arg6[%c0_56, %c0_57, %c0_58], %108 {strides = array<i32>} : memref<1x8x32xf32, #tpu.memory_space<vmem>>, vector<1x8x32xf32>,
    return
  }
  func.func @transform_0(%arg0: i32) -> (i32, i32, i32) {
    %c0_i32 = arith.constant 0 : i32
    %c0_i32_0 = arith.constant 0 : i32
    %c0_i32_1 = arith.constant 0 : i32
    return %arg0, %c0_i32, %c0_i32_0 : i32, i32, i32
  }
  func.func @transform_1(%arg0: i32) -> (i32, i32) {
    %c0_i32 = arith.constant 0 : i32
    %c0_i32_0 = arith.constant 0 : i32
    %c0_i32_1 = arith.constant 0 : i32
    return %c0_i32, %c0_i32_0 : i32, i32
  }
  func.func @transform_2(%arg0: i32) -> (i32, i32) {
    %c0_i32 = arith.constant 0 : i32
    %c0_i32_0 = arith.constant 0 : i32
    %c0_i32_1 = arith.constant 0 : i32
    return %c0_i32, %c0_i32_0 : i32, i32
  }
  func.func @transform_3(%arg0: i32) -> (i32, i32) {
    %c0_i32 = arith.constant 0 : i32
    %c0_i32_0 = arith.constant 0 : i32
    %c0_i32_1 = arith.constant 0 : i32
    return %c0_i32, %c0_i32_0 : i32, i32
  }
  func.func @transform_4(%arg0: i32) -> (i32, i32) {
    %c0_i32 = arith.constant 0 : i32
    %c0_i32_0 = arith.constant 0 : i32
    %c0_i32_1 = arith.constant 0 : i32
    return %c0_i32, %c0_i32_0 : i32, i32
  }
  func.func @transform_5(%arg0: i32) -> (i32, i32, i32) {
    %c0_i32 = arith.constant 0 : i32
    %c0_i32_0 = arith.constant 0 : i32
    %c0_i32_1 = arith.constant 0 : i32
    return %arg0, %c0_i32, %c0_i32_0 : i32, i32, i32
  }
}

</mosaic_0001>

<bundles_post_ra>
// kernel: tpu_custom_call.1
= control target key start
LH: loop header
LB: loop body
LE: loop exit
PB: predicated region body
PF: predicated region fallthrough
CT: control target
= control target key end

     0   :  { %10 = vsyncpa [#allocation5], 0  ;;  %s1950_s0 = inlined_call_operand.hbm [shape: f32[2,8,32], index: 0, kind: input, shape index: {}]   ;;  %s1951_s1 = inlined_call_operand.hbm [shape: bf16[32,96], index: 1, kind: input, shape index: {}]   ;;  %s1952_s2 = inlined_call_operand.vmem [shape: f32[1,96], index: 2, kind: input, shape index: {}]   ;;  %s1953_s3 = inlined_call_operand.hbm [shape: bf16[32,32], index: 3, kind: input, shape index: {}]   ;;  %s1954_s4 = inlined_call_operand.vmem [shape: f32[1,32], index: 4, kind: input, shape index: {}]   ;;  %s1955_s5 = inlined_call_operand.hbm [shape: f32[2,8,32], index: 5, kind: output, shape index: {}]  }
   0x1   :  { %12 = vsyncpa [#allocation5 + $0x1], 0 }
   0x2   :  { %13 = vsyncpa [#allocation8], 0 }
   0x3   :  { %14 = vsyncpa [#allocation6], 0 }
   0x4   :  { %16 = vsyncpa [#allocation6 + $0x1], 0  ;;  %s1616_s18 = smov 0   ;;  %s1618_s19 = smov 0  }
   0x5   :  { %s1620_s20 = smov 0   ;;  %s1622_s21 = smov 0  }
   0x6 LB: > { %s1637_s22 = sadd.s32 4294967295, %s1562_s21   ;;  %s1139_s23 = sadd.s32 4294967294, %s1562_s21   ;;  %s1562_s21 = sphi %s1622_s21, %s1975_s21   ;;  %s1558_s20 = sphi %s1620_s20, %s1974_s20   ;;  %s1554_s19 = sphi %s1618_s19, %s1973_s19   ;;  %s1550_s18 = sphi %s1616_s18, %s1972_s18  }
   0x7   : > { %p42_p0 = scmp.ne.s32.totalorder %s1554_s19, %s1550_s18  ;;  %p1956_p1 = scmp.eq.s32.totalorder %s1637_s22, 0 }
   0x8   : > { %p156_p3 = scmp.eq.s32.totalorder %s1139_s23, 1  ;;  %p1140_p5 = scmp.ge.s32.totalorder %s1562_s21, 1 }
   0x9   : > { %p1646_p4 = por %p1956_p1, %p42_p0  ;;  %p163_p7 = scmp.lt.s32.totalorder %s1562_s21, 3 }
   0xa   : > { %p1651_p6 = por %p156_p3, %p42_p0  ;;  %s1564_s27 = smov [#allocation7]  }
   0xb   : > { %s1959_s24 = scalar_select %p1646_p4, 1, 0 }
   0xc   : > { %s1960_s25 = scalar_select %p1651_p6, 1, 0 }
   0xd   : > { %p1656_p8 = pnand %p1140_p5, %p163_p7  ;;  %s175_s28 = sshll.u32 %s1564_s27, 4  ;;  %s1660_s28 = int_to_ptr.vmem [resolvable:$true] %s175_s28 }
   0xe   : > { %s1565_s30 = smov [#allocation9]   ;;  %s1406_s9 = scalar_lea.hbm %s1951_s1, 256 }
   0xf   : > { %p1307_p9 = pneg %p1656_p8  ;;  %s191_s6 = sshll.u32 %s1565_s30, 4  ;;  %s1671_s6 = int_to_ptr.vmem [resolvable:$true] %s191_s6 }
  0x10   : > { %p1407_p12 = scmp.ne.s32.totalorder %s1951_s1, %s1406_s9  ;;  %p1413_p5 = scmp.lt.u32.totalorder %s1406_s9, %s1951_s1 }
  0x11   : > { %p1667_p11 = pnand %p1307_p9, %p1956_p1 }
  0x13   : > { %p1408_p13 = pneg %p1667_p11 }
  0x15   : > { %p1409_p0 = pnand %p1408_p13, %p1407_p12 }
  0x17   : > { %p1410_p3 = pneg %p1409_p0 }
  0x19   : > { %p1415_p7 = pnand %p1413_p5, %p1410_p3 }
  0x1b   : > { %1418 = shalt.err (!%p1415_p7)
}
  0x1c   : > { %s1419_s14 = scalar_lea.vmem %s1660_s28, 256  ;;  %p1427_p2 = scmp.lt.s32.totalorder %s1660_s28, %s1660_s28 }
  0x1d   : > { %p1420_p9 = scmp.ne.s32.totalorder %s1660_s28, %s1419_s14  ;;  %p1428_p12 = scmp.lt.s32.totalorder %s1419_s14, %s1419_s14 }
  0x1f   : > { %p1422_p10 = pnand %p1420_p9, %p1408_p13  ;;  %p1429_p0 = por %p1428_p12, %p1427_p2 }
  0x21   : > { %p1423_p1 = pneg %p1422_p10 }
  0x23   : > { %p1430_p6 = pnand %p1429_p0, %p1423_p1 }
  0x25   : > { %1433 = shalt.err (!%p1430_p6)
}
  0x26   : > { %s1566_s15 = smov 64   ;;  %s1567_s16 = smov 4  }
  0x27   : > { %1310 = dma.hbm_to_vmem [thread:$0]  (!%p1667_p11), %s1951_s1, 256, %s1660_s28, [#allocation8], %s1566_s15, %s1566_s15, %s1567_s16  }
  0x28   : > { %s1434_s7 = scalar_lea.hbm %s1953_s3, 256 }
  0x29   : > { %p1435_p2 = scmp.ne.s32.totalorder %s1953_s3, %s1434_s7  ;;  %p1441_p10 = scmp.lt.u32.totalorder %s1434_s7, %s1953_s3 }
  0x2b   : > { %p1437_p1 = pnand %p1435_p2, %p1408_p13 }
  0x2d   : > { %p1438_p6 = pneg %p1437_p1 }
  0x2f   : > { %p1443_p3 = pnand %p1441_p10, %p1438_p6 }
  0x31   : > { %1446 = shalt.err (!%p1443_p3)
}
  0x32   : > { %s1447_s28 = scalar_lea.vmem %s1671_s6, 256  ;;  %p1455_p12 = scmp.lt.s32.totalorder %s1671_s6, %s1671_s6 }
  0x33   : > { %p1448_p5 = scmp.ne.s32.totalorder %s1671_s6, %s1447_s28  ;;  %p1456_p0 = scmp.lt.s32.totalorder %s1447_s28, %s1447_s28 }
  0x35   : > { %p1450_p7 = pnand %p1448_p5, %p1408_p13  ;;  %p1457_p2 = por %p1456_p0, %p1455_p12 }
  0x37   : > { %p1451_p9 = pneg %p1450_p7 }
  0x39   : > { %p1458_p1 = pnand %p1457_p2, %p1451_p9 }
  0x3b   : > { %1461 = shalt.err (!%p1458_p1)
}
  0x3c   : > { %1313 = dma.hbm_to_vmem [thread:$0]  (!%p1667_p11), %s1953_s3, 256, %s1671_s6, [#allocation8], %s1566_s15, %s1566_s15, %s1567_s16  }
  0x3d   : > { %s1726_s14 = sadd.s32 1, %s1562_s21   ;;  %s29_s29 = sadd.s32 1, %s1558_s20 }
  0x3e   : > { %s26_s17 = ssub.s32 %s1562_s21, %s1726_s14  ;;  %p36_p13 = scmp.ne.s32.totalorder %s1558_s20, %s1554_s19 }
  0x3f   : > { %p27_p6 = scmp.eq.s32.totalorder %s26_s17, 0  ;;  %p37_p10 = scmp.eq.s32.totalorder %s1562_s21, 0 }
  0x40   : > { %p1963_p3 = scmp.eq.s32.totalorder %s1637_s22, 1  ;;  %p1324_p7 = scmp.lt.s32.totalorder %s1562_s21, 2 }
  0x41   : > { %s1742_s27 = scalar_select %p27_p6, %s1558_s20, %s29_s29  }
  0x42   : > { %p1736_p5 = por %p1963_p3, %p36_p13  ;;  %p38_p9 = por %p37_p10, %p36_p13 }
  0x43   : > { %s208_s30 = sand.u32 1, %s1558_s20   ;;  %s1145_s6 = sshll.u32 %s1562_s21, 7 }
  0x44   : > { %s1964_s23 = scalar_select %p1736_p5, 1, 0 }
  0x45   : > { %s1144_s7 = sshll.u32 %s208_s30, 3  ;;  %s1749_s8 = scalar_lea.hbm %s1950_s0, %s1145_s6 }
  0x46   : > { %s212_s9 = scalar_lea.vmem [#allocation4], %s1144_s7  ;;  %p1753_p11 = pnand %p1324_p7, %p38_p9 }
  0x47   : > { %s219_s10 = sshll.u32 %s212_s9, 4  ;;  %s209_s28 = scalar_lea.sflag [#allocation5], %s208_s30  ;;  %s1751_s10 = int_to_ptr.vmem [resolvable:$true] %s219_s10 }
  0x48   : > { %s1462_s12 = scalar_lea.hbm %s1749_s8, 128  ;;  %p1464_p0 = pneg %p1753_p11 }
  0x49   : > { %p1463_p12 = scmp.ne.s32.totalorder %s1749_s8, %s1462_s12  ;;  %s1467_s17 = scalar_lea.hbm %s1950_s0, 256 }
  0x4a   : > { %p1468_p13 = scmp.lt.u32.totalorder %s1749_s8, %s1950_s0  ;;  %p1469_p6 = scmp.lt.u32.totalorder %s1467_s17, %s1462_s12 }
  0x4b   : > { %p1465_p2 = pnand %p1464_p0, %p1463_p12  ;;  %p1471_p3 = scmp.lt.u32.totalorder %s1462_s12, %s1749_s8 }
  0x4c   : > { %p1470_p10 = por %p1469_p6, %p1468_p13 }
  0x4d   : > { %p1466_p1 = pneg %p1465_p2 }
  0x4e   : > { %p1472_p7 = por %p1471_p3, %p1470_p10 }
  0x50   : > { %p1473_p9 = pnand %p1472_p7, %p1466_p1 }
  0x52   : > { %1476 = shalt.err (!%p1473_p9)
}
  0x53   : > { %s1477_s30 = scalar_lea.vmem %s1751_s10, 128  ;;  %s1568_s15 = smov [#allocation4]  }
  0x54   : > { %p1478_p12 = scmp.ne.s32.totalorder %s1751_s10, %s1477_s30  ;;  %s1482_s16 = sshll.u32 %s1568_s15, 4  ;;  %s1483_s16 = int_to_ptr.vmem [resolvable:$false] %s1482_s16 }
  0x55   : > { %s1484_s9 = scalar_lea.vmem %s1483_s16, 256  ;;  %p1485_p4 = scmp.lt.s32.totalorder %s1751_s10, %s1483_s16 }
  0x56   : > { %p1480_p2 = pnand %p1478_p12, %p1464_p0  ;;  %p1486_p13 = scmp.lt.s32.totalorder %s1484_s9, %s1477_s30 }
  0x58   : > { %p1481_p5 = pneg %p1480_p2  ;;  %p1487_p6 = por %p1486_p13, %p1485_p4 }
  0x5a   : > { %p1488_p10 = pnand %p1487_p6, %p1481_p5 }
  0x5c   : > { %1491 = shalt.err (!%p1488_p10)
}
  0x5d   : > { %1317 = dma.hbm_to_vmem [thread:$0]  (!%p1753_p11), %s1749_s8, 128, %s1751_s10, %s209_s28  }
  0x5e   : > { %228 = sbr.rel (%p1656_p8) target bundleno = 1806 (0x70e), region = 40  ;;  %s1785_s12 = sand.u32 (!%p1656_p8), 1, %s1554_s19  }
  0x5f   : > { %s1147_s13 = sshll.u32 (!%p1656_p8), %s1785_s12, 3  ;;  %s231_s29 = scalar_lea.sflag (!%p1656_p8), [#allocation5], %s1785_s12 }
  0x60   : > { %s234_s17 = scalar_lea.vmem (!%p1656_p8), [#allocation4], %s1147_s13  ;;  %p1966_p4 = scmp.ne.s32.totalorder (!%p1656_p8), %s1959_s24, 0 }
  0x65   : > { %1537 = dma.done.wait (%p1966_p4), %s231_s29, 128  }
  0x66   : > { %1539 = vsyncadd (%p1966_p4), %s231_s29, 4294967168  ;;  %p1967_p5 = scmp.eq.s32.totalorder %s1637_s22, 0 }
  0x68   : > { %1541 = dma.done.wait (%p1967_p5), [#allocation8], 512   ;;  %p1968_p8 = pmov %p1967_p5 }
  0x69   : > { %v1569_v0 = vmov 0.0   ;;  %vm1570_vm0 = vmmov 0   ;;  %v1380_v1 = vld [vmem:[#allocation7] sm:$0xff]   ;;  %v1381_v2 = vld [vmem:[#allocation7 + $0x8] sm:$0xff]   ;;  %s1571_s24 = smov 96   ;;  %s1572_s26 = smov 64  }
  0x6a   : > { %1543 = vsyncadd (%p1968_p8), [#allocation8], 4294966784  ;;  %1215 = vmatprep.subr.bf16.mxu0 %v1569_v0  ;;  %1219 = vmatprep.mubr.msk.bf16.mxu0 %vm1570_vm0, %v1569_v0  ;;  %v1382_v3 = vld [vmem:[#allocation7] sm:$0xff]   ;;  %v1383_v4 = vld [vmem:[#allocation7 + $0x8] sm:$0xff]   ;;  %vm295_vm1 = vcmask 261120   ;;  %vm340_vm2 = vcmask 257024  }
  0x6b   : > { %1223 = vmatprep.subr.bf16.mxu1 %v1569_v0  ;;  %1227 = vmatprep.mubr.msk.bf16.mxu1 %vm1570_vm0, %v1569_v0  ;;  %v1384_v5 = vld [vmem:[#allocation7] sm:$0xff]   ;;  %v1385_v6 = vld [vmem:[#allocation7 + $0x8] sm:$0xff]   ;;  %v270_v7 = vld [vmem:[%s234_s17] sm:$0xff]  ;;  %s1573_s11 = smov 32   ;;  %vm418_vm3 = vcmask 519424   ;;  %vm496_vm4 = vcmask 781824  }
  0x6c   : > { %362 = vrot.lane.b32.xlu0 %v1380_v1, %s1571_s24  ;;  %364 = vrot.lane.b32.xlu1 %v1381_v2, %s1571_s24  ;;  %v1155_v8 = vld [vmem:[%s1952_s2] ss:$0 sm:$0xff]  ;;  %v271_v9 = vpack.c.bf16 %v270_v7, %v270_v7  ;;  %s1574_s28 = smov 88   ;;  %s1575_s7 = smov 80   ;;  %vm504_vm5 = vcmask 64512   ;;  %vm566_vm6 = vcmask 1043456  }
  0x6d   : > { %1216 = vmatpush3.bf16.msra.mxu0 %v1384_v5  ;;  %s1576_s6 = smov 120   ;;  %s1577_s30 = smov 72   ;;  %vm728_vm7 = vcmask 125952   ;;  %vm966_vm8 = vcmask 257152  }
  0x6e   : > { %1217 = vmatprep.subr.bf16.mxu0 %v1569_v0  ;;  %s1578_s15 = smov 112   ;;  %s1579_s16 = smov 104  }
  0x6f   : > { %s1580_s9 = smov 56   ;;  %s1581_s29 = smov 40  }
  0x70   : > { %440 = vrot.lane.b32.xlu0 %v1382_v3, %s1572_s26  ;;  %442 = vrot.lane.b32.xlu1 %v1383_v4, %s1572_s26  ;;  %s1582_s17 = smov 48   ;;  %p1969_p0 = scmp.ne.s32.totalorder %s1964_s23, 0 }
  0x71   : > { %1218 = vmatpush3.bf16.msra.mxu0 %v1385_v6 }
  0x72   : > { %1231 = vmatprep.subr.bf16.mxu0 %v1569_v0 }
  0x74   : > { %368 = vrot.lane.b32.xlu0 %v1155_v8, %s1571_s24  ;;  %446 = vrot.lane.b32.xlu1 %v1155_v8, %s1572_s26 }
  0x75   : > { %1220 = vmatmul.mubr.msk.bf16.vlgmr.msra.gmra.mrb[0].mxu0 %vm295_vm1, %v271_v9 }
  0x76   : > { %1235 = vmatprep.mubr.msk.bf16.mxu0 %vm1570_vm0, %v1569_v0 }
  0xde   : > { %v363_v10 = vpop.permute.xlu0 %362  ;;  %v365_v11 = vpop.permute.xlu1 %364 }
  0xdf   : > { %1224 = vmatpush3.bf16.msra.mxu1 %v363_v10 }
  0xe0   : > { %1225 = vmatprep.subr.bf16.mxu1 %v1569_v0 }
  0xe2   : > { %v441_v12 = vpop.permute.xlu0 %440  ;;  %v443_v13 = vpop.permute.xlu1 %442 }
  0xe3   : > { %1226 = vmatpush3.bf16.msra.mxu1 %v365_v11  ;;  %1232 = vmatpush3.bf16.msra.mxu0 %v441_v12 }
  0xe4   : > { %1233 = vmatprep.subr.bf16.mxu0 %v1569_v0  ;;  %1239 = vmatprep.subr.bf16.mxu1 %v1569_v0 }
  0xe6   : > { %1228 = vmatmul.mubr.msk.bf16.vlgmr.msra.gmra.mrb[0].mxu1 %vm295_vm1, %v271_v9  ;;  %v369_v20 = vpop.permute.xlu0 %368  ;;  %v447_v25 = vpop.permute.xlu1 %446 }
  0xe7   : > { %1234 = vmatpush3.bf16.msra.mxu0 %v443_v13  ;;  %1241 = vmatprep.mubr.msk.bf16.mxu1 %vm1570_vm0, %v1569_v0 }
  0xe8   : > { %1245 = vmatprep.subr.bf16.mxu0 %v1569_v0 }
  0xea   : > { %1236 = vmatmul.mubr.msk.bf16.vlgmr.msra.gmra.mrb[4].mxu0 %vm295_vm1, %v271_v9 }
  0xeb   : > { %1247 = vmatprep.mubr.msk.bf16.mxu0 %vm1570_vm0, %v1569_v0 }
 0x148   : > { %v333_v14 = vpop.f32.mrb[0].mxu0 }
 0x149   : > { %v334_v15 = vadd.f32 %v1155_v8, %v333_v14  ;;  %v1221_v16 = vpop.f32.mrb[1].mxu0 }
 0x14a   : > { %v336_v17 = vpop.f32.mrb[2].mxu0 }
 0x14b   : > { %v339_v18 = vpack.c.bf16 %v334_v15, %v334_v15  ;;  %v1222_v19 = vpop.f32.mrb[3].mxu0 }
 0x14d   : > { %341 = vst.msk [vmem:[#allocation2] sm:$0xf] %vm340_vm2, %v339_v18 }
 0x1b9   : > { %v405_v21 = vpop.f32.mrb[0].mxu1 }
 0x1ba   : > { %v1229_v22 = vpop.f32.mrb[1].mxu1  ;;  %v406_v23 = vadd.f32 %v405_v21, %v369_v20 }
 0x1bb   : > { %v408_v24 = vpop.f32.mrb[2].mxu1 }
 0x1bc   : > { %v1184_v26 = vpack.c.bf16 %v406_v23, %v406_v23  ;;  %v1230_v27 = vpop.f32.mrb[3].mxu1 }
 0x1bd   : > { %v483_v28 = vpop.f32.mrb[4].mxu0 }
 0x1be   : > { %v484_v29 = vadd.f32 %v483_v28, %v447_v25  ;;  %v1237_v30 = vpop.f32.mrb[5].mxu0  ;;  %415 = vrot.lane.b32.xlu0 %v1184_v26, %s1573_s11  ;;  %s1181_s11 = sshll.u32 %s1637_s22, 7  ;;  %s1037_s22 = scalar_lea.sflag [#allocation6], %s1785_s12 }
 0x1bf   : > { %v486_v31 = vpop.f32.mrb[6].mxu0 }
 0x1c0   : > { %v1185_v32 = vpack.c.bf16 %v484_v29, %v484_v29  ;;  %v1238_v33 = vpop.f32.mrb[7].mxu0 }
 0x1c2   : > { %493 = vrot.lane.b32.xlu1 %v1185_v32, %s1572_s26 }
 0x230   : > { %v416_v34 = vpop.permute.xlu0 %415 }
 0x231   : > { %419 = vst.msk [vmem:[#allocation2] sm:$0xf] %vm418_vm3, %v416_v34 }
 0x234   : > { %v494_v35 = vpop.permute.xlu1 %493 }
 0x235   : > { %497 = vst.msk [vmem:[#allocation2] sm:$0xf] %vm496_vm4, %v494_v35 }
 0x23c   : > { %v498_v36 = vld [vmem:[#allocation2] sm:$0xf] }
 0x23d   : > { %v1830_v37 = vcombine.low %v498_v36, %v498_v36  ;;  %v1835_v38 = vld [vmem:[#allocation2] ss:$0 sps:$4 sm:$0xff]  }
 0x23f   : > { %614 = vrot.lane.b32.xlu1 %v1830_v37, %s1574_s28  ;;  %502 = vrot.lane.b32.xlu0 %v1830_v37, %s1571_s24  ;;  %s1583_s24 = smov 8   ;;  %s268_s28 = scalar_lea.vmem [#allocation10], %s1147_s13 }
 0x243   : > { %736 = vrot.lane.b32.xlu1 %v1835_v38, %s1575_s7  ;;  %612 = vrot.lane.b32.xlu0 %v1830_v37, %s1576_s6  ;;  %s1050_s7 = sshll.u32 %s268_s28, 4  ;;  %s1907_s7 = int_to_ptr.vmem [resolvable:$true] %s1050_s7 }
 0x244   : > { %s1492_s13 = scalar_lea.vmem %s1907_s7, 128 }
 0x245   : > { %p1493_p11 = scmp.ne.s32.totalorder %s1907_s7, %s1492_s13 }
 0x247   : > { %846 = vrot.lane.b32.xlu1 %v1835_v38, %s1577_s30  ;;  %734 = vrot.lane.b32.xlu0 %v1835_v38, %s1578_s15  ;;  %s1905_s15 = scalar_lea.hbm %s1955_s5, %s1181_s11  ;;  %p1494_p1 = pnand %p1493_p11, %p1969_p0 }
 0x249   : > { %p1495_p3 = pneg %p1494_p1 }
 0x24b   : > { %844 = vrot.lane.b32.xlu0 %v1835_v38, %s1579_s16  ;;  %s1585_s16 = smov [#allocation10]  }
 0x2b1   : > { %v503_v39 = vpop.permute.xlu0 %502  ;;  %v615_v41 = vpop.permute.xlu1 %614 }
 0x2b2   : > { %v509_v40 = vsel %vm504_vm5, %v503_v39, 0  ;;  %v620_v42 = vsel %vm504_vm5, %v615_v41, 0 }
 0x2b3   : > { %1240 = vmatpush3.bf16.xpose.msra.mxu1 %v509_v40 }
 0x2b4   : > { %1251 = vmatprep.subr.bf16.mxu1 %v1569_v0 }
 0x2b5   : > { %v737_v43 = vpop.permute.xlu1 %736  ;;  %v613_v44 = vpop.permute.xlu0 %612 }
 0x2b6   : > { %v742_v45 = vsel %vm504_vm5, %v737_v43, 0 }
 0x2b9   : > { %v847_v46 = vpop.permute.xlu1 %846  ;;  %v735_v47 = vpop.permute.xlu0 %734 }
 0x2ba   : > { %1242 = vmatmul.mubr.msk.bf16.vlgmr.msra.gmra.mrb[4].mxu1 %vm504_vm5, %v498_v36  ;;  %v852_v48 = vsel %vm504_vm5, %v847_v46, 0 }
 0x2bb   : > { %1252 = vmatpush3.bf16.xpose.msra.mxu1 %v620_v42  ;;  %1253 = vmatprep.mubr.msk.bf16.mxu1 %vm1570_vm0, %v1569_v0 }
 0x2bc   : > { %1263 = vmatprep.subr.bf16.mxu1 %v1569_v0 }
 0x2bd   : > { %v845_v49 = vpop.permute.xlu0 %844 }
 0x2c2   : > { %1254 = vmatmul.mubr.msk.bf16.vlgmr.msra.gmra.mrb[8].mxu1 %vm504_vm5, %v613_v44 }
 0x2c3   : > { %1264 = vmatpush3.bf16.xpose.msra.mxu1 %v742_v45  ;;  %1265 = vmatprep.mubr.msk.bf16.mxu1 %vm1570_vm0, %v1569_v0 }
 0x2c4   : > { %1275 = vmatprep.subr.bf16.mxu1 %v1569_v0 }
 0x2ca   : > { %1266 = vmatmul.mubr.msk.bf16.vlgmr.msra.gmra.mrb[12].mxu1 %vm504_vm5, %v735_v47 }
 0x2cb   : > { %1276 = vmatpush3.bf16.xpose.msra.mxu1 %v852_v48  ;;  %1277 = vmatprep.mubr.msk.bf16.mxu1 %vm1570_vm0, %v1569_v0 }
 0x2cc   : > { %1287 = vmatprep.subr.bf16.mxu1 %v1569_v0 }
 0x2d2   : > { %1278 = vmatmul.mubr.msk.bf16.vlgmr.msra.gmra.mrb[16].mxu1 %vm504_vm5, %v845_v49 }
 0x2d3   : > { %1291 = vmatprep.mubr.msk.bf16.mxu1 %vm1570_vm0, %v1569_v0 }
 0x38d   : > { %v545_v50 = vpop.f32.mrb[4].mxu1 }
 0x38e   : > { %v1243_v51 = vpop.f32.mrb[5].mxu1  ;;  %v551_v52 = vsel %vm504_vm5, %v545_v50, -inf }
 0x38f   : > { %552 = vmax.xlane.f32.xlu1 %v551_v52  ;;  %v548_v53 = vpop.f32.mrb[6].mxu1 }
 0x390   : > { %v1244_v54 = vpop.f32.mrb[7].mxu1 }
 0x395   : > { %v656_v55 = vpop.f32.mrb[8].mxu1 }
 0x396   : > { %v1255_v56 = vpop.f32.mrb[9].mxu1  ;;  %v662_v57 = vsel %vm504_vm5, %v656_v55, -inf }
 0x397   : > { %663 = vmax.xlane.f32.xlu0 %v662_v57  ;;  %v659_v58 = vpop.f32.mrb[10].mxu1 }
 0x398   : > { %v1256_v59 = vpop.f32.mrb[11].mxu1 }
 0x39d   : > { %v778_v60 = vpop.f32.mrb[12].mxu1 }
 0x39e   : > { %v1267_v61 = vpop.f32.mrb[13].mxu1  ;;  %v784_v62 = vsel %vm504_vm5, %v778_v60, -inf }
 0x39f   : > { %785 = vmax.xlane.f32.xlu0 %v784_v62  ;;  %v781_v63 = vpop.f32.mrb[14].mxu1 }
 0x3a0   : > { %672 = vrot.lane.b32.xlu1 %v1830_v37, %s1580_s9  ;;  %v1268_v1 = vpop.f32.mrb[15].mxu1  ;;  %s1496_s9 = sshll.u32 %s1585_s16, 4  ;;  %s1497_s9 = int_to_ptr.vmem [resolvable:$false] %s1496_s9 }
 0x3a1   : > { %p1499_p7 = scmp.lt.s32.totalorder %s1907_s7, %s1497_s9 }
 0x3a5   : > { %v888_v2 = vpop.f32.mrb[16].mxu1 }
 0x3a6   : > { %v1279_v3 = vpop.f32.mrb[17].mxu1  ;;  %v894_v6 = vsel %vm504_vm5, %v888_v2, -inf }
 0x3a7   : > { %v891_v4 = vpop.f32.mrb[18].mxu1 }
 0x3a8   : > { %v1280_v5 = vpop.f32.mrb[19].mxu1 }
 0x3a9   : > { %v1388_v5 = vld [vmem:[#allocation9] sm:$0xff]  }
 0x3aa   : > { %1288 = vmatpush3.bf16.msra.mxu1 %v1388_v5 }
 0x3ab   : > { %1289 = vmatprep.subr.bf16.mxu1 %v1569_v0 }
 0x3b5   : > { %561 = vrot.lane.b32.xlu0 %v1830_v37, %s1572_s26  ;;  %s1584_s26 = smov 16  }
 0x3b9   : > { %904 = vrot.lane.b32.xlu0 %v1835_v38, %s1581_s29  ;;  %s1498_s29 = scalar_lea.vmem %s1497_s9, 256 }
 0x3ba   : > { %p1500_p9 = scmp.lt.s32.totalorder %s1498_s29, %s1492_s13 }
 0x3bc   : > { %p1501_p12 = por %p1500_p9, %p1499_p7 }
 0x3be   : > { %p1502_p2 = pnand %p1501_p12, %p1495_p3 }
 0x3c4   : > { %895 = vmax.xlane.f32.xlu1 %v894_v6  ;;  %v1389_v6 = vld [vmem:[#allocation9 + $0x8] sm:$0xff]  }
 0x3c5   : > { %1290 = vmatpush3.bf16.msra.mxu1 %v1389_v6 }
 0x3d5   : > { %794 = vrot.lane.b32.xlu1 %v1835_v38, %s1582_s17 }
 0x41c   : > { %v553_v7 = vpop.xlane.xlu1 %552 }
 0x41d   : > { %v554_v8 = vsub.f32 %v545_v50, %v553_v7 }
 0x41f   : > { %v555_v9 = vmul.f32 1.442695, %v554_v8 }
 0x420   : > { %v673_v19 = vpop.permute.xlu1 %672 }
 0x421   : > { %1390 = vpow2.f32 %v555_v9  ;;  %v678_v23 = vsel %vm566_vm6, %v673_v19, 0 }
 0x424   : > { %v664_v10 = vpop.xlane.xlu0 %663 }
 0x425   : > { %v665_v11 = vsub.f32 %v656_v55, %v664_v10 }
 0x427   : > { %v666_v12 = vmul.f32 1.442695, %v665_v11 }
 0x429   : > { %1392 = vpow2.f32 %v666_v12 }
 0x42b   : > { %v1391_v16 = vpop.eup %1390 }
 0x42c   : > { %v786_v13 = vpop.xlane.xlu0 %785  ;;  %v560_v21 = vpack.c.bf16 %v1391_v16, %v1391_v16  ;;  %v557_v27 = vsel %vm504_vm5, %v1391_v16, 0.0 }
 0x42d   : > { %v787_v14 = vsub.f32 %v778_v60, %v786_v13 }
 0x42f   : > { %v788_v15 = vmul.f32 1.442695, %v787_v14 }
 0x430   : > { %v562_v17 = vpop.permute.xlu0 %561 }
 0x431   : > { %1394 = vpow2.f32 %v788_v15  ;;  %v568_v18 = vsel %vm566_vm6, %v562_v17, 0 }
 0x432   : > { %1246 = vmatpush3.bf16.msra.mxu0 %v568_v18 }
 0x433   : > { %v1393_v20 = vpop.eup %1392  ;;  %1257 = vmatprep.subr.bf16.mxu0 %v1569_v0 }
 0x434   : > { %v668_v22 = vsel %vm504_vm5, %v1393_v20, 0.0  ;;  %v671_v25 = vpack.c.bf16 %v1393_v20, %v1393_v20  ;;  %v905_v33 = vpop.permute.xlu0 %904 }
 0x435   : > { %669 = vadd.xlane.f32.xlu0 %v668_v22  ;;  %1248 = vmatmul.mubr.msk.bf16.vlgmr.msra.gmra.mrb[8].mxu0 %vm504_vm5, %v560_v21  ;;  %v910_v35 = vsel %vm566_vm6, %v905_v33, 0 }
 0x436   : > { %1258 = vmatpush3.bf16.msra.mxu0 %v678_v23  ;;  %1259 = vmatprep.mubr.msk.bf16.mxu0 %vm1570_vm0, %v1569_v0 }
 0x437   : > { %1269 = vmatprep.subr.bf16.mxu0 %v1569_v0 }
 0x43b   : > { %v1395_v24 = vpop.eup %1394 }
 0x43c   : > { %v790_v26 = vsel %vm504_vm5, %v1395_v24, 0.0  ;;  %v793_v34 = vpack.c.bf16 %v1395_v24, %v1395_v24 }
 0x43d   : > { %791 = vadd.xlane.f32.xlu0 %v790_v26  ;;  %1260 = vmatmul.mubr.msk.bf16.vlgmr.msra.gmra.mrb[12].mxu0 %vm504_vm5, %v671_v25 }
 0x43e   : > { %1271 = vmatprep.mubr.msk.bf16.mxu0 %vm1570_vm0, %v1569_v0 }
 0x441   : > { %558 = vadd.xlane.f32.xlu0 %v557_v27 }
 0x451   : > { %v896_v28 = vpop.xlane.xlu1 %895 }
 0x452   : > { %v897_v29 = vsub.f32 %v888_v2, %v896_v28 }
 0x454   : > { %v898_v30 = vmul.f32 1.442695, %v897_v29 }
 0x455   : > { %v795_v31 = vpop.permute.xlu1 %794 }
 0x456   : > { %1396 = vpow2.f32 %v898_v30  ;;  %v800_v32 = vsel %vm566_vm6, %v795_v31, 0 }
 0x457   : > { %1270 = vmatpush3.bf16.msra.mxu0 %v800_v32 }
 0x458   : > { %1281 = vmatprep.subr.bf16.mxu0 %v1569_v0 }
 0x45a   : > { %1272 = vmatmul.mubr.msk.bf16.vlgmr.msra.gmra.mrb[16].mxu0 %vm504_vm5, %v793_v34 }
 0x45b   : > { %1282 = vmatpush3.bf16.msra.mxu0 %v910_v35  ;;  %1283 = vmatprep.mubr.msk.bf16.mxu0 %vm1570_vm0, %v1569_v0  ;;  %v1176_v0 = vld [vmem:[%s1954_s4] ss:$0 sm:$0xff] }
 0x460   : > { %v1397_v36 = vpop.eup %1396 }
 0x461   : > { %v900_v37 = vsel %vm504_vm5, %v1397_v36, 0.0  ;;  %v903_v38 = vpack.c.bf16 %v1397_v36, %v1397_v36 }
 0x462   : > { %901 = vadd.xlane.f32.xlu1 %v900_v37 }
 0x463   : > { %1284 = vmatmul.mubr.msk.bf16.vlgmr.msra.gmra.mrb[20].mxu0 %vm504_vm5, %v903_v38 }
 0x4c2   : > { %v670_v39 = vpop.xlane.xlu0 %669 }
 0x4c3   : > { %1398 = vrcp.f32 %v670_v39 }
 0x4ca   : > { %v792_v61 = vpop.xlane.xlu0 %791 }
 0x4cd   : > { %v1399_v44 = vpop.eup %1398 }
 0x4ce   : > { %v559_v62 = vpop.xlane.xlu0 %558 }
 0x4ef   : > { %v902_v50 = vpop.xlane.xlu1 %901 }
 0x4f0   : > { %1400 = vrcp.f32 %v902_v50 }
 0x4f1   : > { %1402 = vrcp.f32 %v559_v62 }
 0x4f2   : > { %1404 = vrcp.f32 %v792_v61 }
 0x4fa   : > { %v1401_v55 = vpop.eup %1400 }
 0x4fb   : > { %v1403_v63 = vpop.eup %1402 }
 0x4fc   : > { %v1405_v7 = vpop.eup %1404 }
 0x508   : > { %v604_v40 = vpop.f32.mrb[8].mxu0 }
 0x509   : > { %v1249_v41 = vpop.f32.mrb[9].mxu0  ;;  %v611_v1 = vmul.f32 %v1403_v63, %v604_v40 }
 0x50a   : > { %v607_v42 = vpop.f32.mrb[10].mxu0 }
 0x50b   : > { %v1250_v43 = vpop.f32.mrb[11].mxu0 }
 0x510   : > { %v714_v45 = vpop.f32.mrb[12].mxu0 }
 0x511   : > { %v721_v46 = vmul.f32 %v1399_v44, %v714_v45  ;;  %v1261_v47 = vpop.f32.mrb[13].mxu0 }
 0x512   : > { %v717_v48 = vpop.f32.mrb[14].mxu0 }
 0x513   : > { %723 = vrot.lane.b32.xlu0 %v721_v46, %s1583_s24  ;;  %v1262_v49 = vpop.f32.mrb[15].mxu0 }
 0x52d   : > { %v836_v51 = vpop.f32.mrb[16].mxu0 }
 0x52e   : > { %v1273_v52 = vpop.f32.mrb[17].mxu0  ;;  %v843_v8 = vmul.f32 %v1405_v7, %v836_v51 }
 0x52f   : > { %v839_v53 = vpop.f32.mrb[18].mxu0 }
 0x530   : > { %v1274_v54 = vpop.f32.mrb[19].mxu0 }
 0x536   : > { %v946_v56 = vpop.f32.mrb[20].mxu0 }
 0x537   : > { %v953_v57 = vmul.f32 %v1401_v55, %v946_v56  ;;  %v1285_v58 = vpop.f32.mrb[21].mxu0 }
 0x538   : > { %v949_v59 = vpop.f32.mrb[22].mxu0 }
 0x539   : > { %955 = vrot.lane.b32.xlu1 %v953_v57, %s1583_s24  ;;  %v1286_v60 = vpop.f32.mrb[23].mxu0 }
 0x585   : > { %v724_v2 = vpop.permute.xlu0 %723 }
 0x586   : > { %v726_v3 = vsel %vm504_vm5, %v611_v1, %v724_v2 }
 0x587   : > { %v727_v4 = vpack.c.bf16 %v726_v3, %v726_v3 }
 0x589   : > { %729 = vst.msk [vmem:[#allocation3] sm:$0xf] %vm728_vm7, %v727_v4 }
 0x5ab   : > { %v956_v9 = vpop.permute.xlu1 %955 }
 0x5ac   : > { %v958_v10 = vsel %vm504_vm5, %v843_v8, %v956_v9 }
 0x5ad   : > { %v1186_v11 = vpack.c.bf16 %v958_v10, %v958_v10 }
 0x5af   : > { %963 = vrot.lane.b32.xlu1 %v1186_v11, %s1584_s26 }
 0x621   : > { %v964_v12 = vpop.permute.xlu1 %963 }
 0x622   : > { %967 = vst.msk [vmem:[#allocation3] sm:$0xf] %vm966_vm8, %v964_v12 }
 0x629   : > { %v968_v13 = vld [vmem:[#allocation3] sm:$0xf] }
 0x62a   : > { %1292 = vmatmul.mubr.msk.bf16.vlgmr.msra.gmra.mrb[20].mxu1 %vm295_vm1, %v968_v13 }
 0x6fd   : > { %v1029_v14 = vpop.f32.mrb[20].mxu1 }
 0x6fe   : > { %v1030_v15 = vadd.f32 %v1176_v0, %v1029_v14  ;;  %v1293_v16 = vpop.f32.mrb[21].mxu1 }
 0x6ff   : > { %v1032_v17 = vpop.f32.mrb[22].mxu1 }
 0x700   : > { %v1294_v18 = vpop.f32.mrb[23].mxu1  ;;  %1035 = vst.msk [vmem:[%s268_s28] sm:$0xff] %vm295_vm1, %v1030_v15 }
 0x701   : > { %1505 = shalt.err (!%p1502_p2)
}
 0x702   : > { %s1506_s12 = scalar_lea.hbm %s1905_s15, 128  ;;  %s1510_s26 = scalar_lea.hbm %s1955_s5, 256 }
 0x703   : > { %p1507_p13 = scmp.ne.s32.totalorder %s1905_s15, %s1506_s12  ;;  %p1511_p4 = scmp.lt.u32.totalorder %s1905_s15, %s1955_s5 }
 0x704   : > { %p1512_p5 = scmp.lt.u32.totalorder %s1510_s26, %s1506_s12  ;;  %p1514_p11 = scmp.lt.u32.totalorder %s1506_s12, %s1905_s15 }
 0x705   : > { %p1508_p6 = pnand %p1507_p13, %p1969_p0 }
 0x706   : > { %p1513_p8 = por %p1512_p5, %p1511_p4 }
 0x707   : > { %p1509_p10 = pneg %p1508_p6 }
 0x708   : > { %p1515_p1 = por %p1514_p11, %p1513_p8 }
 0x70a   : > { %p1516_p3 = pnand %p1515_p1, %p1509_p10 }
 0x70c   : > { %1519 = shalt.err (!%p1516_p3)
}
 0x70d   : > { %1305 = dma.vmem_to_hbm [thread:$0]  (%p1969_p0), %s1907_s7, 128, %s1905_s15, %s1037_s22  }
 0x70e PF: > { %s1062_s11 = sand.u32 1, %s1550_s18   ;;  %p1970_p7 = scmp.ne.s32.totalorder %s1960_s25, 0 }
 0x70f   : > { %p1971_p9 = scmp.ge.s32.totalorder %s1562_s21, 2  ;;  %s1063_s28 = scalar_lea.sflag [#allocation6], %s1062_s11 }
 0x711   : > { %p1319_p12 = pnand %p1971_p9, %p1970_p7 }
 0x713   : > { %1545 = dma.done.wait (!%p1319_p12), %s1063_s28, 128  }
 0x714   : > { %1547 = vsyncadd (!%p1319_p12), %s1063_s28, 4294967168  ;;  %p19_p2 = scmp.ge.s32.totalorder %s1726_s14, 4   ;;  %s1972_s18 = smov %s1554_s19 }
 0x715   : > { %s1973_s19 = smov %s1558_s20  ;;  %s1974_s20 = smov %s1742_s27 }
 0x716   : > { %s1975_s21 = smov %s1726_s14  ;;  %21 = sbr.rel (!%p19_p2) target bundleno = 6 (0x6), region = 93 }
 0x71d   :  { %1068 = vsyncpa [#allocation5], 1 }
 0x71e   :  { %1070 = vsyncpa [#allocation5 + $0x1], 1 }
 0x71f   :  { %1071 = vsyncpa [#allocation8], 1 }
 0x720   :  { %1072 = vsyncpa [#allocation6], 1 }
 0x721   :  { %1074 = vsyncpa [#allocation6 + $0x1], 1 }

</bundles_post_ra>
